<compile_context>
chip_gen: v6e
topology: v6e:2x2x1
jax: 0.10.0
libtpu: 0.0.40
codegen_flags: <defaults>
</compile_context>

<pallas_src>
import jax
import jax.numpy as jnp
from jax.experimental import pallas as pl
from jax.experimental.pallas import tpu as pltpu

MAX_LOGSTD = 10  # parity with the PyTorch module (not used in forward)


def _round_up(x, m):
    return (x + m - 1) // m * m


# ----------------------------- Pallas kernels ------------------------------ #
def feature_kernel(x_ref, wd_ref, bd_ref, wcat_ref, xw_ref):
    """Per row-tile: xw = relu(x @ Wd + bd) @ W_cat  (dropout = identity, eval).

    x_ref   : [TM, Fx]   node-feature row tile (bf16)
    wd_ref  : [Fx, cp]   dense weight, pre-transposed, zero-padded (bf16)
    bd_ref  : [1, cp]    dense bias, zero-padded (f32)
    wcat_ref: [cp, cp]   fused conv_mu|conv_logstd weights, padded (bf16)
    xw_ref  : [TM, cp]   output (bf16)
    """
    h = jnp.dot(x_ref[...], wd_ref[...], preferred_element_type=jnp.float32)
    h = jnp.maximum(h + bd_ref[...], 0.0)
    xw = jnp.dot(h.astype(jnp.bfloat16), wcat_ref[...],
                 preferred_element_type=jnp.float32)
    xw_ref[...] = xw.astype(xw_ref.dtype)


def propagate_kernel(a_ref, xw_ref, bcat_ref, out_ref, acc_ref):
    """K-tiled propagation: acc += A_tile @ xw_tile; finalize with bias on last k.

    a_ref   : [TM, TK]   normalized-adjacency tile (bf16)
    xw_ref  : [TK, cp]   transformed-feature tile (bf16)
    bcat_ref: [1, cp]    fused bias [b_mu | b_ls | 0...] (f32)
    out_ref : [TM, cp]   fused output slab (f32); mu = [:, :z], logstd = [:, z:2z]
    acc_ref : [TM, cp]   f32 VMEM accumulator (scratch)
    """
    k = pl.program_id(1)

    @pl.when(k == 0)
    def _():
        acc_ref[...] = jnp.zeros_like(acc_ref)

    acc_ref[...] += jnp.dot(a_ref[...], xw_ref[...],
                            preferred_element_type=jnp.float32)

    @pl.when(k == pl.num_programs(1) - 1)
    def _():
        out_ref[...] = acc_ref[...] + bcat_ref[...]


# ------------------------------ glue (JAX) --------------------------------- #
def gcn_normalized_adjacency_padded(edge_index, edge_weight, num_nodes, n_pad):
    """Dense A_hat = D^{-1/2}(A+I)D^{-1/2}, built directly at the padded shape,
    cast to bf16 (PyG GCNConv gcn_norm semantics, edge weights, self-loop 1)."""
    row = edge_index[0]                                  # source nodes j
    col = edge_index[1]                                  # target nodes i
    loops = jnp.arange(num_nodes, dtype=edge_index.dtype)
    row = jnp.concatenate([row, loops])
    col = jnp.concatenate([col, loops])
    ew = jnp.concatenate([edge_weight.reshape(-1).astype(jnp.float32),
                          jnp.ones((num_nodes,), jnp.float32)])
    deg = jnp.zeros((num_nodes,), jnp.float32).at[col].add(ew)   # target-side degree
    deg_inv_sqrt = jnp.where(deg > 0, jax.lax.rsqrt(deg), 0.0)
    norm = deg_inv_sqrt[row] * ew * deg_inv_sqrt[col]
    # messages flow source(row) -> target(col):  A_hat[i, j] = norm(j->i)
    a = jnp.zeros((n_pad, n_pad), jnp.float32).at[col, row].add(norm)
    return a.astype(jnp.bfloat16)


def init_encoder_params(key, x_features, z_features):
    """Deterministic synthetic parameter init (shapes match the PyTorch module)."""
    twoz = 2 * z_features
    ks = jax.random.split(key, 6)
    return {
        "dense_w": jax.random.normal(ks[0], (twoz, x_features), jnp.float32) * 0.2,
        "dense_b": jax.random.normal(ks[1], (twoz,), jnp.float32) * 0.1,
        "mu_w":    jax.random.normal(ks[2], (z_features, twoz), jnp.float32) * 0.2,
        "mu_b":    jax.random.normal(ks[3], (z_features,), jnp.float32) * 0.1,
        "ls_w":    jax.random.normal(ks[4], (z_features, twoz), jnp.float32) * 0.2,
        "ls_b":    jax.random.normal(ks[5], (z_features,), jnp.float32) * 0.1,
    }


def _pick_row_tile(n):
    """Row tile: multiple of 16 (bf16 sublane pairing); minimize padded rows."""
    if n <= 128:
        return _round_up(max(n, 16), 16)
    candidates = sorted(((_round_up(n, t), -t, t) for t in (256, 128)))
    return candidates[0][2]


def _pick_k_tile(n_pad):
    """Largest K tile (<=2048, lane-aligned) that divides the padded node count."""
    for tk in (2048, 1024, 512, 256, 128):
        if n_pad % tk == 0:
            return tk
    return n_pad


@jax.jit
def encoder_forward(params, x, edge_index, edge_attr):
    """Pallas-backed forward. Returns (mu, logstd), each [N, z_features]."""
    n_nodes, fx = x.shape
    z = params["mu_w"].shape[0]
    twoz = 2 * z
    cp = _round_up(twoz, 128)            # lane-dense fused head width

    tm = _pick_row_tile(n_nodes)
    n_pad = _round_up(n_nodes, tm)
    tk = _pick_k_tile(n_pad)
    row_steps = n_pad // tm
    k_steps = n_pad // tk

    # --- adjacency: built directly at padded shape, bf16 (O(N^2) operand) ---
    a_pad = gcn_normalized_adjacency_padded(edge_index, edge_attr, n_nodes, n_pad)

    # --- inputs / parameters: bf16 MXU operands, zero-padded to lane width ---
    x_pad = jnp.zeros((n_pad, fx), jnp.bfloat16).at[:n_nodes].set(
        x.astype(jnp.bfloat16))
    wd = jnp.zeros((fx, cp), jnp.bfloat16).at[:, :twoz].set(
        params["dense_w"].T.astype(jnp.bfloat16))
    bd = jnp.zeros((1, cp), jnp.float32).at[:, :twoz].set(
        params["dense_b"].reshape(1, -1))
    wcat = jnp.concatenate([params["mu_w"], params["ls_w"]], axis=0).T   # [2z, 2z]
    wcat_pad = jnp.zeros((cp, cp), jnp.bfloat16).at[:twoz, :twoz].set(
        wcat.astype(jnp.bfloat16))
    bcat = jnp.zeros((1, cp), jnp.float32).at[:, :twoz].set(
        jnp.concatenate([params["mu_b"], params["ls_b"]]).reshape(1, -1))

    # --- call A: per-row-tile feature transform, xw = relu(xWd + bd) Wcat ---
    xw = pl.pallas_call(
        feature_kernel,
        out_shape=jax.ShapeDtypeStruct((n_pad, cp), jnp.bfloat16),
        grid=(row_steps,),
        in_specs=[
            pl.BlockSpec((tm, fx), lambda i: (i, 0)),
            pl.BlockSpec((fx, cp), lambda i: (0, 0)),
            pl.BlockSpec((1, cp), lambda i: (0, 0)),
            pl.BlockSpec((cp, cp), lambda i: (0, 0)),
        ],
        out_specs=pl.BlockSpec((tm, cp), lambda i: (i, 0)),
        compiler_params=pltpu.CompilerParams(
            dimension_semantics=("parallel",)),
    )(x_pad, wd, bd, wcat_pad)

    # --- call B: K-tiled propagation, out = A_hat @ xw + b_cat -------------
    a_index = lambda i, k: (i, k)
    if k_steps >= 3:
        # Deeper buffering on the HBM-bound A_hat stream; fall back gracefully
        # if this jax version's BlockSpec doesn't accept pipeline_mode.
        try:
            a_spec = pl.BlockSpec((tm, tk), a_index, pipeline_mode=pl.Buffered(3))
        except TypeError:
            a_spec = pl.BlockSpec((tm, tk), a_index)
    else:
        a_spec = pl.BlockSpec((tm, tk), a_index)

    out = pl.pallas_call(
        propagate_kernel,
        out_shape=jax.ShapeDtypeStruct((n_pad, cp), jnp.float32),
        grid=(row_steps, k_steps),
        in_specs=[
            a_spec,                                            # A_hat tile (bf16)
            pl.BlockSpec((tk, cp), lambda i, k: (k, 0)),       # xw K-tile (bf16)
            pl.BlockSpec((1, cp), lambda i, k: (0, 0)),        # fused bias (f32)
        ],
        out_specs=pl.BlockSpec((tm, cp), lambda i, k: (i, 0)),
        scratch_shapes=[pltpu.VMEM((tm, cp), jnp.float32)],
        compiler_params=pltpu.CompilerParams(
            dimension_semantics=("parallel", "arbitrary")),
        cost_estimate=pl.CostEstimate(
            flops=2 * n_pad * n_pad * cp,
            transcendentals=0,
            bytes_accessed=n_pad * n_pad * 2        # bf16 A_hat
                           + n_pad * cp * 2         # bf16 xw
                           + n_pad * cp * 4),       # f32 output
    )(a_pad, xw, bcat)

    mu = out[:n_nodes, :z]
    logstd = out[:n_nodes, z:twoz]
    return mu, logstd


# ------------------------------ reference ---------------------------------- #
def encoder_forward_ref(params, x, edge_index, edge_attr):
    n = x.shape[0]
    row, col = edge_index[0], edge_index[1]
    loops = jnp.arange(n, dtype=edge_index.dtype)
    row = jnp.concatenate([row, loops])
    col = jnp.concatenate([col, loops])
    ew = jnp.concatenate([edge_attr.reshape(-1).astype(jnp.float32),
                          jnp.ones((n,), jnp.float32)])
    deg = jnp.zeros((n,), jnp.float32).at[col].add(ew)
    dis = jnp.where(deg > 0, jax.lax.rsqrt(deg), 0.0)
    norm = dis[row] * ew * dis[col]
    a_hat = jnp.zeros((n, n), jnp.float32).at[col, row].add(norm)
    h = jnp.maximum(x @ params["dense_w"].T + params["dense_b"], 0.0)
    mu = a_hat @ (h @ params["mu_w"].T) + params["mu_b"]
    ls = a_hat @ (h @ params["ls_w"].T) + params["ls_b"]
    return mu, ls


# -------------------------------- main ------------------------------------- #
if __name__ == "__main__":
    def run_case(n_nodes, x_features, z_features, n_edges, seed):
        key = jax.random.PRNGKey(seed)
        k_x, k_e, k_w, k_p = jax.random.split(key, 4)
        x = jax.random.normal(k_x, (n_nodes, x_features), jnp.float32)
        edge_index = jax.random.randint(k_e, (2, n_edges), 0, n_nodes,
                                        dtype=jnp.int32)
        edge_attr = jax.random.uniform(k_w, (n_edges,), jnp.float32, 0.1, 1.0)
        params = init_encoder_params(k_p, x_features, z_features)

        mu, logstd = encoder_forward(params, x, edge_index, edge_attr)
        mu = jax.block_until_ready(mu)
        logstd = jax.block_until_ready(logstd)

        mu_ref, ls_ref = encoder_forward_ref(params, x, edge_index, edge_attr)
        assert mu.shape == (n_nodes, z_features)
        assert logstd.shape == (n_nodes, z_features)
        # bf16 operands with f32 accumulation -> relaxed tolerance
        assert jnp.allclose(mu, mu_ref, atol=5e-2, rtol=5e-2), \
            float(jnp.max(jnp.abs(mu - mu_ref)))
        assert jnp.allclose(logstd, ls_ref, atol=5e-2, rtol=5e-2), \
            float(jnp.max(jnp.abs(logstd - ls_ref)))

    # tiny case: single row tile, single K step
    run_case(n_nodes=16, x_features=8, z_features=4, n_edges=32, seed=0)
    # small case that exercises the K-tiled accumulator path (grid 3x3)
    run_case(n_nodes=384, x_features=8, z_features=4, n_edges=800, seed=1)

    print("KERNEL_OK")
</pallas_src>

<mosaic_0001>
module attributes {stable_mosaic.version = 11 : i64} {
  func.func private @main(%arg0: i32) attributes {dimension_semantics = [#tpu.dimension_semantics<core_parallel>], iteration_bounds = array<i64: 2>, tpu.core_type = #tpu.core_type<sc_scalar_subcore>, window_params = []} {
    return
  }
}

module attributes {stable_mosaic.version = 11 : i64} {
  func.func private @main(%arg0: i32) attributes {dimension_semantics = [#tpu.dimension_semantics<core_parallel>], iteration_bounds = array<i64: 2>, tpu.core_type = #tpu.core_type<sc_scalar_subcore>, window_params = []} {
    return
  }
}

module attributes {stable_mosaic.version = 11 : i64} {
  func.func @feature_kernel(%arg0: i32, %arg1: memref<16x8xbf16, #tpu.memory_space<vmem>>, %arg2: memref<8x128xbf16, #tpu.memory_space<vmem>>, %arg3: memref<1x128xf32, #tpu.memory_space<vmem>>, %arg4: memref<128x128xbf16, #tpu.memory_space<vmem>>, %arg5: memref<16x128xbf16, #tpu.memory_space<vmem>>) attributes {dimension_semantics = [#tpu.dimension_semantics<parallel>], iteration_bounds = array<i64: 1>, scalar_prefetch = 0 : i64, scratch_operands = 0 : i64, tpu.core_type = #tpu.core_type<tc>, window_params = [{transform_indices = @transform_0, window_bounds = array<i64: 16, 8>}, {pipeline_mode = #tpu.pipeline_mode<synchronous>, transform_indices = @transform_1, window_bounds = array<i64: 8, 128>}, {pipeline_mode = #tpu.pipeline_mode<synchronous>, transform_indices = @transform_2, window_bounds = array<i64: 1, 128>}, {pipeline_mode = #tpu.pipeline_mode<synchronous>, transform_indices = @transform_3, window_bounds = array<i64: 128, 128>}, {transform_indices = @transform_4, window_bounds = array<i64: 16, 128>}]} {
    %c0 = arith.constant 0 : index
    %c0_0 = arith.constant 0 : index
    %0 = vector.load %arg1[%c0, %c0_0] : memref<16x8xbf16, #tpu.memory_space<vmem>>, vector<16x8xbf16>
    %c0_1 = arith.constant 0 : index
    %c0_2 = arith.constant 0 : index
    %1 = vector.load %arg2[%c0_1, %c0_2] : memref<8x128xbf16, #tpu.memory_space<vmem>>, vector<8x128xbf16>
    %cst = arith.constant dense<0.000000e+00> : vector<16x128xf32>
    %2 = tpu.matmul %0, %1, %cst {dimension_numbers = #tpu.dot_dimension_numbers<[1], [0], [0], [1], [0, 0, 1, 1], [], []>} : vector<16x8xbf16>, vector<8x128xbf16>, vector<16x128xf32> -> vector<16x128xf32>
    %c0_3 = arith.constant 0 : index
    %c0_4 = arith.constant 0 : index
    %3 = vector.load %arg3[%c0_3, %c0_4] : memref<1x128xf32, #tpu.memory_space<vmem>>, vector<1x128xf32>
    %4 = vector.broadcast %3 : vector<1x128xf32> to vector<16x128xf32>
    %5 = arith.addf %2, %4 : vector<16x128xf32>
    %cst_5 = arith.constant 0.000000e+00 : f32
    %6 = vector.broadcast %cst_5 : f32 to vector<16x128xf32>
    %7 = arith.maximumf %5, %6 : vector<16x128xf32>
    %8 = arith.truncf %7 : vector<16x128xf32> to vector<16x128xbf16>
    %c0_6 = arith.constant 0 : index
    %c0_7 = arith.constant 0 : index
    %9 = vector.load %arg4[%c0_6, %c0_7] : memref<128x128xbf16, #tpu.memory_space<vmem>>, vector<128x128xbf16>
    %cst_8 = arith.constant dense<0.000000e+00> : vector<16x128xf32>
    %10 = tpu.matmul %8, %9, %cst_8 {dimension_numbers = #tpu.dot_dimension_numbers<[1], [0], [0], [1], [0, 0, 1, 1], [], []>} : vector<16x128xbf16>, vector<128x128xbf16>, vector<16x128xf32> -> vector<16x128xf32>
    %11 = arith.truncf %10 : vector<16x128xf32> to vector<16x128xbf16>
    %c0_9 = arith.constant 0 : index
    %c0_10 = arith.constant 0 : index
    %12 = vector.load %arg5[%c0_9, %c0_10] : memref<16x128xbf16, #tpu.memory_space<vmem>>, vector<16x128xbf16>
    tpu.vector_store %arg5[%c0_9, %c0_10], %11 {strides = array<i32>} : memref<16x128xbf16, #tpu.memory_space<vmem>>, vector<16x128xbf16>,
    return
  }
  func.func @transform_0(%arg0: i32) -> (i32, i32) {
    %c0_i32 = arith.constant 0 : i32
    %c0_i32_0 = arith.constant 0 : i32
    return %arg0, %c0_i32 : i32, i32
  }
  func.func @transform_1(%arg0: i32) -> (i32, i32) {
    %c0_i32 = arith.constant 0 : i32
    %c0_i32_0 = arith.constant 0 : i32
    %c0_i32_1 = arith.constant 0 : i32
    return %c0_i32, %c0_i32_0 : i32, i32
  }
  func.func @transform_2(%arg0: i32) -> (i32, i32) {
    %c0_i32 = arith.constant 0 : i32
    %c0_i32_0 = arith.constant 0 : i32
    %c0_i32_1 = arith.constant 0 : i32
    return %c0_i32, %c0_i32_0 : i32, i32
  }
  func.func @transform_3(%arg0: i32) -> (i32, i32) {
    %c0_i32 = arith.constant 0 : i32
    %c0_i32_0 = arith.constant 0 : i32
    %c0_i32_1 = arith.constant 0 : i32
    return %c0_i32, %c0_i32_0 : i32, i32
  }
  func.func @transform_4(%arg0: i32) -> (i32, i32) {
    %c0_i32 = arith.constant 0 : i32
    %c0_i32_0 = arith.constant 0 : i32
    return %arg0, %c0_i32 : i32, i32
  }
}

module attributes {stable_mosaic.version = 11 : i64} {
  func.func @propagate_kernel(%arg0: i32, %arg1: i32, %arg2: memref<16x16xbf16, #tpu.memory_space<vmem>>, %arg3: memref<16x128xbf16, #tpu.memory_space<vmem>>, %arg4: memref<1x128xf32, #tpu.memory_space<vmem>>, %arg5: memref<16x128xf32, #tpu.memory_space<vmem>>, %arg6: memref<16x128xf32, #tpu.memory_space<vmem>>) attributes {dimension_semantics = [#tpu.dimension_semantics<parallel>, #tpu.dimension_semantics<arbitrary>], iteration_bounds = array<i64: 1, 1>, scalar_prefetch = 0 : i64, scratch_operands = 1 : i64, tpu.core_type = #tpu.core_type<tc>, window_params = [{transform_indices = @transform_0, window_bounds = array<i64: 16, 16>}, {transform_indices = @transform_1, window_bounds = array<i64: 16, 128>}, {pipeline_mode = #tpu.pipeline_mode<synchronous>, transform_indices = @transform_2, window_bounds = array<i64: 1, 128>}, {transform_indices = @transform_3, window_bounds = array<i64: 16, 128>}]} {
    %c0_i32 = arith.constant 0 : i32
    %0 = arith.cmpi eq, %arg1, %c0_i32 : i32
    %1 = arith.extui %0 : i1 to i32
    %c0_i32_0 = arith.constant 0 : i32
    %2 = arith.cmpi ne, %1, %c0_i32_0 : i32
    scf.if %2 {
      %cst_10 = arith.constant 0.000000e+00 : f32
      %12 = vector.broadcast %cst_10 : f32 to vector<16x128xf32>
      %c0_11 = arith.constant 0 : index
      %c0_12 = arith.constant 0 : index
      %13 = vector.load %arg6[%c0_11, %c0_12] : memref<16x128xf32, #tpu.memory_space<vmem>>, vector<16x128xf32>
      tpu.vector_store %arg6[%c0_11, %c0_12], %12 {strides = array<i32>} : memref<16x128xf32, #tpu.memory_space<vmem>>, vector<16x128xf32>,
    } else {
    }
    %c0 = arith.constant 0 : index
    %c0_1 = arith.constant 0 : index
    %3 = vector.load %arg6[%c0, %c0_1] : memref<16x128xf32, #tpu.memory_space<vmem>>, vector<16x128xf32>
    %c0_2 = arith.constant 0 : index
    %c0_3 = arith.constant 0 : index
    %4 = vector.load %arg2[%c0_2, %c0_3] : memref<16x16xbf16, #tpu.memory_space<vmem>>, vector<16x16xbf16>
    %c0_4 = arith.constant 0 : index
    %c0_5 = arith.constant 0 : index
    %5 = vector.load %arg3[%c0_4, %c0_5] : memref<16x128xbf16, #tpu.memory_space<vmem>>, vector<16x128xbf16>
    %cst = arith.constant dense<0.000000e+00> : vector<16x128xf32>
    %6 = tpu.matmul %4, %5, %cst {dimension_numbers = #tpu.dot_dimension_numbers<[1], [0], [0], [1], [0, 0, 1, 1], [], []>} : vector<16x16xbf16>, vector<16x128xbf16>, vector<16x128xf32> -> vector<16x128xf32>
    %7 = arith.addf %3, %6 : vector<16x128xf32>
    %c0_6 = arith.constant 0 : index
    %c0_7 = arith.constant 0 : index
    %8 = vector.load %arg6[%c0_6, %c0_7] : memref<16x128xf32, #tpu.memory_space<vmem>>, vector<16x128xf32>
    tpu.vector_store %arg6[%c0_6, %c0_7], %7 {strides = array<i32>} : memref<16x128xf32, #tpu.memory_space<vmem>>, vector<16x128xf32>,
    %c0_i32_8 = arith.constant 0 : i32
    %9 = arith.cmpi eq, %arg1, %c0_i32_8 : i32
    %10 = arith.extui %9 : i1 to i32
    %c0_i32_9 = arith.constant 0 : i32
    %11 = arith.cmpi ne, %10, %c0_i32_9 : i32
    scf.if %11 {
      %c0_10 = arith.constant 0 : index
      %c0_11 = arith.constant 0 : index
      %12 = vector.load %arg6[%c0_10, %c0_11] : memref<16x128xf32, #tpu.memory_space<vmem>>, vector<16x128xf32>
      %c0_12 = arith.constant 0 : index
      %c0_13 = arith.constant 0 : index
      %13 = vector.load %arg4[%c0_12, %c0_13] : memref<1x128xf32, #tpu.memory_space<vmem>>, vector<1x128xf32>
      %14 = vector.broadcast %13 : vector<1x128xf32> to vector<16x128xf32>
      %15 = arith.addf %12, %14 : vector<16x128xf32>
      %c0_14 = arith.constant 0 : index
      %c0_15 = arith.constant 0 : index
      %16 = vector.load %arg5[%c0_14, %c0_15] : memref<16x128xf32, #tpu.memory_space<vmem>>, vector<16x128xf32>
      tpu.vector_store %arg5[%c0_14, %c0_15], %15 {strides = array<i32>} : memref<16x128xf32, #tpu.memory_space<vmem>>, vector<16x128xf32>,
    } else {
    }
    return
  }
  func.func @transform_0(%arg0: i32, %arg1: i32) -> (i32, i32) {
    %c0_i32 = arith.constant 0 : i32
    return %arg0, %arg1 : i32, i32
  }
  func.func @transform_1(%arg0: i32, %arg1: i32) -> (i32, i32) {
    %c0_i32 = arith.constant 0 : i32
    %c0_i32_0 = arith.constant 0 : i32
    return %arg1, %c0_i32 : i32, i32
  }
  func.func @transform_2(%arg0: i32, %arg1: i32) -> (i32, i32) {
    %c0_i32 = arith.constant 0 : i32
    %c0_i32_0 = arith.constant 0 : i32
    %c0_i32_1 = arith.constant 0 : i32
    return %c0_i32, %c0_i32_0 : i32, i32
  }
  func.func @transform_3(%arg0: i32, %arg1: i32) -> (i32, i32) {
    %c0_i32 = arith.constant 0 : i32
    %c0_i32_0 = arith.constant 0 : i32
    return %arg0, %c0_i32 : i32, i32
  }
}

</mosaic_0001>

<bundles_post_ra>
// kernel: encoder_forward.2
= control target key start
LH: loop header
LB: loop body
LE: loop exit
PB: predicated region body
PF: predicated region fallthrough
CT: control target
= control target key end

     0   :  { %vm37_vm0 = vcmask 1043456   ;;  %v272_v0 = vmov 0.0   ;;  %vm273_vm1 = vmmov 0   ;;  %vm33_vm2 = vcmask 64512   ;;  %s335_s1 = inlined_call_operand.vmem [shape: bf16[8,128], index: 1, kind: input, shape index: {}]   ;;  %s336_s0 = inlined_call_operand.vmem [shape: bf16[16,8], index: 0, kind: input, shape index: {}]   ;;  %s337_s3 = inlined_call_operand.vmem [shape: bf16[128,128], index: 3, kind: input, shape index: {}]   ;;  %s338_s2 = inlined_call_operand.vmem [shape: f32[1,128], index: 2, kind: input, shape index: {}]   ;;  %s339_s4 = inlined_call_operand.vmem [shape: bf16[16,128], index: 4, kind: output, shape index: {}]  }
   0x1   :  { %235 = vmatprep.subr.bf16.mxu0 %v272_v0  ;;  %v20_v1 = vld [vmem:[%s335_s1] sm:$0xf]  ;;  %237 = vmatprep.mubr.msk.bf16.mxu0 %vm273_vm1, %v272_v0  ;;  %v264_v4 = vld [vmem:[%s337_s3 + $0x38] sm:$0xff]   ;;  %v265_v5 = vld [vmem:[%s337_s3 + $0x30] sm:$0xff]  }
   0x2   :  { %v39_v2 = vsel %vm37_vm0, %v20_v1, 0  ;;  %v263_v3 = vld [vmem:[%s336_s0] sm:$0xff]   ;;  %241 = vmatprep.subr.bf16.mxu1 %v272_v0  ;;  %257 = vmatprep.mubr.msk.bf16.mxu1 %vm273_vm1, %v272_v0  ;;  %v266_v6 = vld [vmem:[%s337_s3 + $0x28] sm:$0xff]   ;;  %v268_v8 = vld [vmem:[%s337_s3 + $0x18] sm:$0xff]  }
   0x3   :  { %236 = vmatpush3.bf16.msra.mxu0 %v39_v2  ;;  %242 = vmatpush3.bf16.msra.mxu1 %v264_v4  ;;  %v267_v7 = vld [vmem:[%s337_s3 + $0x20] sm:$0xff]   ;;  %v269_v9 = vld [vmem:[%s337_s3 + $0x10] sm:$0xff]   ;;  %v270_v10 = vld [vmem:[%s337_s3 + $0x8] sm:$0xff]  }
   0x4   :  { %243 = vmatprep.subr.bf16.mxu1 %v272_v0  ;;  %v271_v11 = vld [vmem:[%s337_s3] sm:$0xff]  }
   0x5   :  { %v204_v12 = vld [vmem:[%s338_s2] ss:$0 sm:$0xff] }
   0x6   :  { %238 = vmatmul.mubr.msk.bf16.vlgmr.msra.gmra.mxu0 %vm33_vm2, %v263_v3 }
   0x7   :  { %244 = vmatpush3.bf16.msra.mxu1 %v265_v5 }
   0x8   :  { %245 = vmatprep.subr.bf16.mxu1 %v272_v0 }
   0xb   :  { %246 = vmatpush3.bf16.msra.mxu1 %v266_v6 }
   0xc   :  { %247 = vmatprep.subr.bf16.mxu1 %v272_v0 }
   0xf   :  { %248 = vmatpush3.bf16.msra.mxu1 %v267_v7 }
  0x10   :  { %249 = vmatprep.subr.bf16.mxu1 %v272_v0 }
  0x13   :  { %250 = vmatpush3.bf16.msra.mxu1 %v268_v8 }
  0x14   :  { %251 = vmatprep.subr.bf16.mxu1 %v272_v0 }
  0x17   :  { %252 = vmatpush3.bf16.msra.mxu1 %v269_v9 }
  0x18   :  { %253 = vmatprep.subr.bf16.mxu1 %v272_v0 }
  0x1b   :  { %254 = vmatpush3.bf16.msra.mxu1 %v270_v10 }
  0x1c   :  { %255 = vmatprep.subr.bf16.mxu1 %v272_v0 }
  0x1f   :  { %256 = vmatpush3.bf16.msra.mxu1 %v271_v11 }
  0xc6   :  { %v75_v13 = vpop.f32.mrf.mxu0 }
  0xc7   :  { %v76_v15 = vadd.f32 %v204_v12, %v75_v13 }
  0xc8   :  { %v239_v14 = vpop.f32.mrf.mxu0 }
  0xc9   :  { %v82_v19 = vmax.f32 %v76_v15, 0.0 }
  0xca   :  { %v78_v16 = vpop.f32.mrf.mxu0 }
  0xcb   :  { %v79_v17 = vadd.f32 %v204_v12, %v78_v16 }
  0xcc   :  { %v240_v18 = vpop.f32.mrf.mxu0 }
  0xcd   :  { %v83_v20 = vmax.f32 %v79_v17, 0.0 }
  0xcf   :  { %v84_v21 = vpack.c.bf16 %v83_v20, %v82_v19 }
  0xd1   :  { %258 = vmatmul.mubr.bf16.vlgmr.msra.gmra.mxu1 %v84_v21 }
 0x191   :  { %v183_v22 = vpop.f32.mrf.mxu1 }
 0x193   :  { %v259_v23 = vpop.f32.mrf.mxu1 }
 0x195   :  { %v186_v24 = vpop.f32.mrf.mxu1 }
 0x196   :  { %v222_v25 = vpack.c.bf16 %v186_v24, %v183_v22 }
 0x197   :  { %v260_v26 = vpop.f32.mrf.mxu1 }
 0x198   :  { %223 = vst [vmem:[%s339_s4] sm:$0xff] %v222_v25  }

// kernel: encoder_forward.3
= control target key start
LH: loop header
LB: loop body
LE: loop exit
PB: predicated region body
PF: predicated region fallthrough
CT: control target
= control target key end

     0   :  { %v123_v0 = vmov 0.0   ;;  %vm124_vm0 = vmmov 0   ;;  %vm38_vm1 = vcmask 130048   ;;  %s160_s1 = inlined_call_operand.vmem [shape: bf16[16,128], index: 1, kind: input, shape index: {}]   ;;  %s161_s0 = inlined_call_operand.vmem [shape: bf16[16,16], index: 0, kind: input, shape index: {}]   ;;  %s162_s2 = inlined_call_operand.vmem [shape: f32[1,128], index: 2, kind: input, shape index: {}]   ;;  %s163_s3 = inlined_call_operand.vmem [shape: f32[16,128], index: 3, kind: output, shape index: {}]  }
   0x1   :  { %113 = vmatprep.subr.bf16.mxu0 %v123_v0  ;;  %v121_v1 = vld [vmem:[%s160_s1] sm:$0xff]   ;;  %115 = vmatprep.mubr.msk.bf16.mxu0 %vm124_vm0, %v123_v0 }
   0x2   :  { %v122_v2 = vld [vmem:[%s161_s0] sm:$0xff]   ;;  %114 = vmatpush3.bf16.msra.mxu0 %v121_v1 }
   0x3   :  { %v110_v3 = vld [vmem:[%s162_s2] ss:$0 sm:$0xff] }
   0x5   :  { %116 = vmatmul.mubr.msk.bf16.vlgmr.msra.gmra.mxu0 %vm38_vm1, %v122_v2 }
  0xc5   :  { %v76_v4 = vpop.f32.mrf.mxu0 }
  0xc6   :  { %v99_v5 = vadd.f32 %v110_v3, %v76_v4 }
  0xc7   :  { %v117_v6 = vpop.f32.mrf.mxu0 }
  0xc8   :  { %101 = vst [vmem:[%s163_s3] sm:$0xff] %v99_v5 }
  0xc9   :  { %v79_v7 = vpop.f32.mrf.mxu0 }
  0xca   :  { %v100_v8 = vadd.f32 %v110_v3, %v79_v7 }
  0xcb   :  { %v118_v9 = vpop.f32.mrf.mxu0 }
  0xcc   :  { %102 = vst [vmem:[%s163_s3 + $0x8] sm:$0xff] %v100_v8 }

</bundles_post_ra>
